<compile_context>
chip_gen: v7x
topology: tpu7x:2x2x1
jax: 0.10.0
libtpu: 0.0.40
codegen_flags: <defaults>
</compile_context>

<pallas_src>
import jax
import jax.numpy as jnp
from jax.experimental import pallas as pl
from jax.experimental.pallas import tpu as pltpu


# ----------------------------------------------------------------------------
# Recommended path: pure metadata reshape (== torch.Tensor.view semantics).
# ----------------------------------------------------------------------------
def unflatten(x: jax.Array, C: int, H: int, W: int) -> jax.Array:
    N, flat = x.shape
    assert flat == C * H * W, f"expected last dim {C * H * W}, got {flat}"
    return x.reshape(N, C, H, W)


# ----------------------------------------------------------------------------
# Optional Pallas kernel path (tiled streaming copy + free reshape).
# ----------------------------------------------------------------------------
def _copy_kernel(x_ref, o_ref):
    # Whole (TM, flat) tile for this grid step: straight VMEM copy.
    o_ref[...] = x_ref[...]


def _choose_tm(N: int, flat: int, dtype_bytes: int) -> int:
    """Pick a row-tile height TM (multiple of 8).

    Budget against the smallest default scoped VMEM (16 MiB on v5e); with
    default double buffering on both input and output we need
        4 * TM * flat * dtype_bytes <= budget.
    Cap at 512 rows (measured knee of the copy roofline on v6e), and never
    exceed N rounded up to a multiple of 8.
    """
    budget = 16 * 1024 * 1024
    max_tm_vmem = budget // (4 * flat * dtype_bytes)
    max_tm_vmem = max(8, (max_tm_vmem // 8) * 8)
    n_rounded = max(8, ((N + 7) // 8) * 8)
    return min(512, max_tm_vmem, n_rounded)


def unflatten_pallas(x: jax.Array, C: int, H: int, W: int) -> jax.Array:
    """Unflatten implemented as a tiled Pallas HBM->VMEM->HBM copy.

    Functionally identical to `unflatten`; only useful when the copy itself is
    desired (benchmarking / fusion). Otherwise prefer the free reshape above.
    """
    N, flat = x.shape
    assert flat == C * H * W, f"expected last dim {C * H * W}, got {flat}"

    dtype_bytes = jnp.dtype(x.dtype).itemsize
    tm = _choose_tm(N, flat, dtype_bytes)
    grid = (pl.cdiv(N, tm),)

    y_flat = pl.pallas_call(
        _copy_kernel,
        out_shape=jax.ShapeDtypeStruct((N, flat), x.dtype),
        grid_spec=pltpu.PrefetchScalarGridSpec(
            num_scalar_prefetch=0,
            grid=grid,
            # Last block dim == full array extent -> exempt from the 128 rule
            # and keeps stores lane-dense. TM is a multiple of 8 (sublanes).
            in_specs=[pl.BlockSpec((tm, flat), lambda i: (i, 0))],
            out_specs=pl.BlockSpec((tm, flat), lambda i: (i, 0)),
        ),
        compiler_params=pltpu.CompilerParams(
            dimension_semantics=("parallel",),  # shard row blocks across TCs
        ),
    )(x)

    # Metadata-only reshape (same element order as torch .view) -> NCHW.
    return y_flat.reshape(N, C, H, W)


if __name__ == "__main__":
    # Small shapes consistent with the module (default H=W=7; shrunk C, a few
    # batch rows so the row-tiled grid is actually exercised).
    N, C, H, W = 16, 8, 7, 7
    key = jax.random.PRNGKey(0)
    x = jax.random.normal(key, (N, C * H * W), dtype=jnp.float32)

    # Run the Pallas kernel path once and block on it.
    out = unflatten_pallas(x, C, H, W)
    out = jax.block_until_ready(out)

    # Reference: the recommended zero-copy path (== torch .view semantics).
    ref = unflatten(x, C, H, W)

    assert out.shape == (N, C, H, W)
    assert out.dtype == x.dtype
    assert jnp.array_equal(out, ref)

    print("KERNEL_OK")
</pallas_src>

<mosaic_0001>
module attributes {stable_mosaic.version = 11 : i64} {
  func.func @_copy_kernel(%arg0: i32, %arg1: memref<16x392xf32, #tpu.memory_space<vmem>>, %arg2: memref<16x392xf32, #tpu.memory_space<vmem>>) attributes {dimension_semantics = [#tpu.dimension_semantics<parallel>], iteration_bounds = array<i64: 1>, scalar_prefetch = 0 : i64, scratch_operands = 0 : i64, tpu.core_type = #tpu.core_type<tc>, window_params = [{transform_indices = @transform_0, window_bounds = array<i64: 16, 392>}, {transform_indices = @transform_1, window_bounds = array<i64: 16, 392>}]} {
    %c0 = arith.constant 0 : index
    %c0_0 = arith.constant 0 : index
    %0 = vector.load %arg1[%c0, %c0_0] : memref<16x392xf32, #tpu.memory_space<vmem>>, vector<16x392xf32>
    %c0_1 = arith.constant 0 : index
    %c0_2 = arith.constant 0 : index
    %1 = vector.load %arg2[%c0_1, %c0_2] : memref<16x392xf32, #tpu.memory_space<vmem>>, vector<16x392xf32>
    tpu.vector_store %arg2[%c0_1, %c0_2], %0 {strides = array<i32>} : memref<16x392xf32, #tpu.memory_space<vmem>>, vector<16x392xf32>,
    return
  }
  func.func @transform_0(%arg0: i32) -> (i32, i32) {
    %c0_i32 = arith.constant 0 : i32
    %c0_i32_0 = arith.constant 0 : i32
    return %arg0, %c0_i32 : i32, i32
  }
  func.func @transform_1(%arg0: i32) -> (i32, i32) {
    %c0_i32 = arith.constant 0 : i32
    %c0_i32_0 = arith.constant 0 : i32
    return %arg0, %c0_i32 : i32, i32
  }
}

</mosaic_0001>

<bundles_post_ra>
// kernel: tpu_custom_call.1
= control target key start
LH: loop header
LB: loop body
LE: loop exit
PB: predicated region body
PF: predicated region fallthrough
CT: control target
= control target key end

     0   :  { %6 = vsyncpa [#allocation3], 0  ;;  %s155_s0 = inlined_call_operand.hbm [shape: f32[16,392], index: 0, kind: input, shape index: {}]   ;;  %s156_s1 = inlined_call_operand.hbm [shape: f32[16,392], index: 1, kind: output, shape index: {}]  }
   0x1   :  { %7 = vsyncpa [#allocation4], 0  ;;  %s109_s6 = smov [#allocation2]   ;;  %s61_s10 = scalar_lea.hbm %s155_s0, 1024 }
   0x2   :  { %s13_s7 = sshll.u32 %s109_s6, 4  ;;  %p62_p0 = scmp.ne.s32.totalorder %s155_s0, %s61_s10  ;;  %s14_s7 = int_to_ptr.vmem [resolvable:$true] %s13_s7 }
   0x3   :  { %p65_p1 = scmp.lt.u32.totalorder %s61_s10, %s155_s0 }
   0x5   :  { %p67_p2 = pnand %p65_p1, %p62_p0 }
   0x7   :  { %70 = shalt.err (!%p67_p2)
}
   0x8   :  { %s71_s15 = scalar_lea.vmem %s14_s7, 1024  ;;  %p76_p4 = scmp.lt.s32.totalorder %s14_s7, %s14_s7 }
   0x9   :  { %p72_p3 = scmp.ne.s32.totalorder %s14_s7, %s71_s15  ;;  %p77_p5 = scmp.lt.s32.totalorder %s71_s15, %s71_s15 }
   0xb   :  { %p78_p6 = por %p77_p5, %p76_p4 }
   0xd   :  { %p79_p7 = pnand %p78_p6, %p72_p3 }
   0xf   :  { %82 = shalt.err (!%p79_p7)
}
  0x10   :  { %s110_s16 = smov 512   ;;  %s111_s17 = smov 32  }
  0x11   :  { %19 = dma.hbm_to_vmem [thread:$0]  %s155_s0, 1024, %s14_s7, [#allocation3], %s110_s16, %s110_s16, %s111_s17  }
  0x12   :  { %105 = dma.done.wait [#allocation3], 1024  }
  0x13   :  { %106 = vsyncadd [#allocation3], 4294966272  ;;  %s112_s20 = smov [#allocation5]   ;;  %vm34_vm0 = vcmask 64512   ;;  %v23_v0 = vld [vmem:[#allocation2] sm:$0xff]  ;;  %v24_v1 = vld [vmem:[#allocation2 + $0x8] sm:$0xff] }
  0x14   :  { %s45_s21 = sshll.u32 %s112_s20, 4  ;;  %v25_v2 = vld [vmem:[#allocation2 + $0x10] sm:$0xff]  ;;  %31 = vst [vmem:[#allocation5] sm:$0xff] %v23_v0  ;;  %32 = vst [vmem:[#allocation5 + $0x8] sm:$0xff] %v24_v1  ;;  %v26_v3 = vld [vmem:[#allocation2 + $0x18] sm:$0xff]  ;;  %s46_s21 = int_to_ptr.vmem [resolvable:$true] %s45_s21 }
  0x15   :  { %33 = vst [vmem:[#allocation5 + $0x10] sm:$0xff] %v25_v2  ;;  %v27_v4 = vld [vmem:[#allocation2 + $0x20] sm:$0xff]  ;;  %v28_v5 = vld [vmem:[#allocation2 + $0x28] sm:$0xff]  ;;  %35 = vst.msk [vmem:[#allocation5 + $0x18] sm:$0xff] %vm34_vm0, %v26_v3  ;;  %s83_s0 = scalar_lea.vmem %s46_s21, 1024  ;;  %p88_p9 = scmp.lt.s32.totalorder %s46_s21, %s46_s21 }
  0x16   :  { %36 = vst [vmem:[#allocation5 + $0x20] sm:$0xff] %v27_v4  ;;  %37 = vst [vmem:[#allocation5 + $0x28] sm:$0xff] %v28_v5  ;;  %v29_v6 = vld [vmem:[#allocation2 + $0x30] sm:$0xff]  ;;  %v30_v7 = vld [vmem:[#allocation2 + $0x38] sm:$0xff]  ;;  %p84_p8 = scmp.ne.s32.totalorder %s46_s21, %s83_s0  ;;  %p89_p10 = scmp.lt.s32.totalorder %s83_s0, %s83_s0 }
  0x17   :  { %38 = vst [vmem:[#allocation5 + $0x30] sm:$0xff] %v29_v6  ;;  %39 = vst.msk [vmem:[#allocation5 + $0x38] sm:$0xff] %vm34_vm0, %v30_v7 }
  0x18   :  { %p90_p11 = por %p89_p10, %p88_p9 }
  0x1a   :  { %p91_p12 = pnand %p90_p11, %p84_p8 }
  0x1c   :  { %94 = shalt.err (!%p91_p12)
}
  0x1d   :  { %s95_s24 = scalar_lea.hbm %s156_s1, 1024 }
  0x1e   :  { %p96_p13 = scmp.ne.s32.totalorder %s156_s1, %s95_s24  ;;  %p99_p0 = scmp.lt.u32.totalorder %s95_s24, %s156_s1 }
  0x20   :  { %p101_p1 = pnand %p99_p0, %p96_p13 }
  0x22   :  { %104 = shalt.err (!%p101_p1)
}
  0x23   :  { %51 = dma.vmem_to_hbm [thread:$0]  %s46_s21, 1024, %s156_s1, [#allocation4], %s110_s16, %s110_s16, %s111_s17  }
  0x24   :  { %107 = dma.done.wait [#allocation4], 1024  }
  0x25   :  { %108 = vsyncadd [#allocation4], 4294966272 }
  0x26   :  { %55 = vsyncpa [#allocation3], 1 }
  0x27   :  { %56 = vsyncpa [#allocation4], 1 }

</bundles_post_ra>
